<compile_context>
chip_gen: v6e
topology: v6e:2x2x1
jax: 0.10.0
libtpu: 0.0.40
codegen_flags: <defaults>
</compile_context>

<pallas_src>
import numpy as np
import jax
import jax.numpy as jnp
from jax.experimental import pallas as pl
from jax.experimental.pallas import tpu as pltpu


def _round_up(x, m):
    return ((x + m - 1) // m) * m


def actor_kernel(x_ref, w1_ref, b1_ref, w2_ref, b2_ref, w3_ref, b3_ref, o_ref):
    # One (TB, in1) batch tile per grid step; weights/biases are VMEM-resident
    # (constant index_maps), so per-step HBM traffic is just the activation
    # stream in and the narrow (TB, action_size) result out.
    x = x_ref[...]

    # fc1 + ReLU (f32; K=32 is tiny, keep precision on the input path).
    h1 = jnp.dot(x, w1_ref[...], preferred_element_type=jnp.float32) + b1_ref[...]
    h1 = jnp.maximum(h1, 0.0)

    # fc2 + ReLU — cast the (TB, 256) intermediate to the weight dtype
    # (bf16 by default): halves VMEM vst/vld bytes and speeds up the MXU;
    # accumulation stays f32.
    h1 = h1.astype(w2_ref.dtype)
    h2 = jnp.dot(h1, w2_ref[...], preferred_element_type=jnp.float32) + b2_ref[...]
    h2 = jnp.maximum(h2, 0.0)

    # fc3 + tanh — narrow (action_size-wide) output, stored directly.
    h2 = h2.astype(w3_ref.dtype)
    h3 = jnp.dot(h2, w3_ref[...], preferred_element_type=jnp.float32) + b3_ref[...]
    o_ref[...] = jnp.tanh(h3).astype(o_ref.dtype)


def actor_forward(state, params, *, action_size, tb=2048, core_parallel=False):
    """state: (B, state_size*2) f32. params: padded kernel params (pad_actor_params)."""
    w1, b1 = params["w1"], params["b1"]
    w2, b2 = params["w2"], params["b2"]
    w3, b3 = params["w3"], params["b3"]

    B, in1 = state.shape
    F1 = w1.shape[1]          # 256
    F2P = w2.shape[1]         # fc2_units zero-padded to multiple of 128 (256)
    A = w3.shape[1]           # action_size, kept narrow (no lane padding)
    assert A == action_size

    # Only sublane (8) alignment padding, at most 7 rows.  The grid uses cdiv,
    # so a ragged last batch block is handled by Pallas — no full-tile pad of
    # the activation stream.
    Bp = _round_up(B, 8)
    if Bp != B:
        state = jnp.pad(state, ((0, Bp - B), (0, 0)))

    TB = min(tb, Bp)          # multiple of 8; sized well under 64 MiB/TC (v7x)
    grid = (pl.cdiv(Bp, TB),)

    bytes_w = int(w1.size * w1.dtype.itemsize + b1.size * b1.dtype.itemsize
                  + w2.size * w2.dtype.itemsize + b2.size * b2.dtype.itemsize
                  + w3.size * w3.dtype.itemsize + b3.size * b3.dtype.itemsize)
    cost = pl.CostEstimate(
        flops=2 * Bp * (in1 * F1 + F1 * F2P + F2P * A),
        transcendentals=Bp * A,
        bytes_accessed=4 * Bp * in1 + 4 * Bp * A + bytes_w,
    )

    # On v7x set core_parallel=True to shard the batch grid across both
    # TensorCores; "parallel" is kept as the portable default.
    dim_sem = (pltpu.CORE_PARALLEL,) if core_parallel else ("parallel",)

    out = pl.pallas_call(
        actor_kernel,
        out_shape=jax.ShapeDtypeStruct((Bp, A), jnp.float32),
        grid_spec=pltpu.PrefetchScalarGridSpec(
            num_scalar_prefetch=0,
            grid=grid,
            in_specs=[
                pl.BlockSpec((TB, in1), lambda i: (i, 0)),   # activation stream
                pl.BlockSpec((in1, F1), lambda i: (0, 0)),   # w1 (VMEM-resident)
                pl.BlockSpec((1, F1), lambda i: (0, 0)),     # b1
                pl.BlockSpec((F1, F2P), lambda i: (0, 0)),   # w2
                pl.BlockSpec((1, F2P), lambda i: (0, 0)),    # b2
                pl.BlockSpec((F2P, A), lambda i: (0, 0)),    # w3 (narrow N)
                pl.BlockSpec((1, A), lambda i: (0, 0)),      # b3
            ],
            out_specs=pl.BlockSpec((TB, A), lambda i: (i, 0)),
        ),
        compiler_params=pltpu.CompilerParams(
            dimension_semantics=dim_sem,
            vmem_limit_bytes=48 << 20,
        ),
        cost_estimate=cost,
    )(state, w1, b1, w2, b2, w3, b3)

    # Strip the (<=7-row) sublane-alignment padding.
    return out[:B]


def init_actor_params(key, state_size, action_size, fc1_units=256, fc2_units=150):
    """Deterministic init mirroring the PyTorch module's reset_parameters().

    hidden_init() in the reference uses weight.size(0) == out_features as
    'fan_in' (intentional mirror of the PyTorch quirk — do not "fix"), so
    lim1 = 1/sqrt(fc1_units), lim2 = 1/sqrt(fc2_units).
    Biases keep the default nn.Linear init: U(-1/sqrt(in_features), +...).
    Weights are stored transposed vs PyTorch: (in_features, out_features).
    """
    in1 = state_size * 2
    k = jax.random.split(key, 6)
    lim1 = 1.0 / np.sqrt(fc1_units)
    lim2 = 1.0 / np.sqrt(fc2_units)
    lim3 = 0.003
    b1_lim = 1.0 / np.sqrt(in1)
    b2_lim = 1.0 / np.sqrt(fc1_units)
    b3_lim = 1.0 / np.sqrt(fc2_units)
    return {
        "w1": jax.random.uniform(k[0], (in1, fc1_units), jnp.float32, -lim1, lim1),
        "b1": jax.random.uniform(k[1], (1, fc1_units), jnp.float32, -b1_lim, b1_lim),
        "w2": jax.random.uniform(k[2], (fc1_units, fc2_units), jnp.float32, -lim2, lim2),
        "b2": jax.random.uniform(k[3], (1, fc2_units), jnp.float32, -b2_lim, b2_lim),
        "w3": jax.random.uniform(k[4], (fc2_units, action_size), jnp.float32, -lim3, lim3),
        "b3": jax.random.uniform(k[5], (1, action_size), jnp.float32, -b3_lim, b3_lim),
    }


def pad_actor_params(params, *, use_bf16=True):
    """Zero-pad fc2 features to a multiple of 128; keep action dim narrow.

    Numerically exact padding: padded fc2 lanes get bias 0 (ReLU(0)=0) and the
    corresponding rows of w3 are zero.  When use_bf16, w2/w3 are stored in
    bfloat16 (matmul accumulation remains f32 inside the kernel).
    """
    w1, b1 = params["w1"], params["b1"]
    w2, b2 = params["w2"], params["b2"]
    w3, b3 = params["w3"], params["b3"]
    f1, f2 = w2.shape
    a = w3.shape[1]
    f2p = _round_up(f2, 128)
    w2p = jnp.zeros((f1, f2p), w2.dtype).at[:, :f2].set(w2)
    b2p = jnp.zeros((1, f2p), b2.dtype).at[:, :f2].set(b2)
    w3p = jnp.zeros((f2p, a), w3.dtype).at[:f2, :].set(w3)
    wdt = jnp.bfloat16 if use_bf16 else jnp.float32
    return {"w1": w1, "b1": b1,
            "w2": w2p.astype(wdt), "b2": b2p,
            "w3": w3p.astype(wdt), "b3": b3}


def actor_forward_ref(state, params):
    h1 = jnp.maximum(state @ params["w1"] + params["b1"], 0.0)
    h2 = jnp.maximum(h1 @ params["w2"] + params["b2"], 0.0)
    return jnp.tanh(h2 @ params["w3"] + params["b3"])


if __name__ == "__main__":
    state_size = 16
    action_size = 4
    batch = 8

    key = jax.random.PRNGKey(0)
    k_params, k_state = jax.random.split(key)
    params = init_actor_params(k_params, state_size, action_size)
    kparams = pad_actor_params(params, use_bf16=True)

    # forward() consumes a tensor whose last dim is state_size * 2
    state = jax.random.normal(k_state, (batch, state_size * 2), jnp.float32)

    out = actor_forward(state, kparams, action_size=action_size)
    out = jax.block_until_ready(out)

    # Reference in full f32 against the unpadded params; tolerance relaxed for
    # the bf16 fc2/fc3 path (output is dominated by the exact f32 biases).
    ref = actor_forward_ref(state, params)
    np.testing.assert_allclose(np.asarray(out), np.asarray(ref), rtol=1e-2, atol=2e-3)

    print("KERNEL_OK")
</pallas_src>

<mosaic_0001>
module attributes {stable_mosaic.version = 11 : i64} {
  func.func @actor_kernel(%arg0: i32, %arg1: memref<8x32xf32, #tpu.memory_space<vmem>>, %arg2: memref<32x256xf32, #tpu.memory_space<vmem>>, %arg3: memref<1x256xf32, #tpu.memory_space<vmem>>, %arg4: memref<256x256xbf16, #tpu.memory_space<vmem>>, %arg5: memref<1x256xf32, #tpu.memory_space<vmem>>, %arg6: memref<256x4xbf16, #tpu.memory_space<vmem>>, %arg7: memref<1x4xf32, #tpu.memory_space<vmem>>, %arg8: memref<8x4xf32, #tpu.memory_space<vmem>>) attributes {dimension_semantics = [#tpu.dimension_semantics<parallel>], iteration_bounds = array<i64: 1>, scalar_prefetch = 0 : i64, scratch_operands = 0 : i64, tpu.core_type = #tpu.core_type<tc>, window_params = [{transform_indices = @transform_0, window_bounds = array<i64: 8, 32>}, {pipeline_mode = #tpu.pipeline_mode<synchronous>, transform_indices = @transform_1, window_bounds = array<i64: 32, 256>}, {pipeline_mode = #tpu.pipeline_mode<synchronous>, transform_indices = @transform_2, window_bounds = array<i64: 1, 256>}, {pipeline_mode = #tpu.pipeline_mode<synchronous>, transform_indices = @transform_3, window_bounds = array<i64: 256, 256>}, {pipeline_mode = #tpu.pipeline_mode<synchronous>, transform_indices = @transform_4, window_bounds = array<i64: 1, 256>}, {pipeline_mode = #tpu.pipeline_mode<synchronous>, transform_indices = @transform_5, window_bounds = array<i64: 256, 4>}, {pipeline_mode = #tpu.pipeline_mode<synchronous>, transform_indices = @transform_6, window_bounds = array<i64: 1, 4>}, {transform_indices = @transform_7, window_bounds = array<i64: 8, 4>}]} {
    %c0 = arith.constant 0 : index
    %c0_0 = arith.constant 0 : index
    %0 = vector.load %arg1[%c0, %c0_0] : memref<8x32xf32, #tpu.memory_space<vmem>>, vector<8x32xf32>
    %c0_1 = arith.constant 0 : index
    %c0_2 = arith.constant 0 : index
    %1 = vector.load %arg2[%c0_1, %c0_2] : memref<32x256xf32, #tpu.memory_space<vmem>>, vector<32x256xf32>
    %cst = arith.constant dense<0.000000e+00> : vector<8x256xf32>
    %2 = tpu.matmul %0, %1, %cst {dimension_numbers = #tpu.dot_dimension_numbers<[1], [0], [0], [1], [0, 0, 1, 1], [], []>} : vector<8x32xf32>, vector<32x256xf32>, vector<8x256xf32> -> vector<8x256xf32>
    %c0_3 = arith.constant 0 : index
    %c0_4 = arith.constant 0 : index
    %3 = vector.load %arg3[%c0_3, %c0_4] : memref<1x256xf32, #tpu.memory_space<vmem>>, vector<1x256xf32>
    %4 = vector.broadcast %3 : vector<1x256xf32> to vector<8x256xf32>
    %5 = arith.addf %2, %4 : vector<8x256xf32>
    %cst_5 = arith.constant 0.000000e+00 : f32
    %6 = vector.broadcast %cst_5 : f32 to vector<8x256xf32>
    %7 = arith.maximumf %5, %6 : vector<8x256xf32>
    %8 = arith.truncf %7 : vector<8x256xf32> to vector<8x256xbf16>
    %c0_6 = arith.constant 0 : index
    %c0_7 = arith.constant 0 : index
    %9 = vector.load %arg4[%c0_6, %c0_7] : memref<256x256xbf16, #tpu.memory_space<vmem>>, vector<256x256xbf16>
    %cst_8 = arith.constant dense<0.000000e+00> : vector<8x256xf32>
    %10 = tpu.matmul %8, %9, %cst_8 {dimension_numbers = #tpu.dot_dimension_numbers<[1], [0], [0], [1], [0, 0, 1, 1], [], []>} : vector<8x256xbf16>, vector<256x256xbf16>, vector<8x256xf32> -> vector<8x256xf32>
    %c0_9 = arith.constant 0 : index
    %c0_10 = arith.constant 0 : index
    %11 = vector.load %arg5[%c0_9, %c0_10] : memref<1x256xf32, #tpu.memory_space<vmem>>, vector<1x256xf32>
    %12 = vector.broadcast %11 : vector<1x256xf32> to vector<8x256xf32>
    %13 = arith.addf %10, %12 : vector<8x256xf32>
    %cst_11 = arith.constant 0.000000e+00 : f32
    %14 = vector.broadcast %cst_11 : f32 to vector<8x256xf32>
    %15 = arith.maximumf %13, %14 : vector<8x256xf32>
    %16 = arith.truncf %15 : vector<8x256xf32> to vector<8x256xbf16>
    %c0_12 = arith.constant 0 : index
    %c0_13 = arith.constant 0 : index
    %17 = vector.load %arg6[%c0_12, %c0_13] : memref<256x4xbf16, #tpu.memory_space<vmem>>, vector<256x4xbf16>
    %cst_14 = arith.constant dense<0.000000e+00> : vector<8x4xf32>
    %18 = tpu.matmul %16, %17, %cst_14 {dimension_numbers = #tpu.dot_dimension_numbers<[1], [0], [0], [1], [0, 0, 1, 1], [], []>} : vector<8x256xbf16>, vector<256x4xbf16>, vector<8x4xf32> -> vector<8x4xf32>
    %c0_15 = arith.constant 0 : index
    %c0_16 = arith.constant 0 : index
    %19 = vector.load %arg7[%c0_15, %c0_16] : memref<1x4xf32, #tpu.memory_space<vmem>>, vector<1x4xf32>
    %20 = vector.broadcast %19 : vector<1x4xf32> to vector<8x4xf32>
    %21 = arith.addf %18, %20 : vector<8x4xf32>
    %22 = math.tanh %21 : vector<8x4xf32>
    %c0_17 = arith.constant 0 : index
    %c0_18 = arith.constant 0 : index
    %23 = vector.load %arg8[%c0_17, %c0_18] : memref<8x4xf32, #tpu.memory_space<vmem>>, vector<8x4xf32>
    tpu.vector_store %arg8[%c0_17, %c0_18], %22 {strides = array<i32>} : memref<8x4xf32, #tpu.memory_space<vmem>>, vector<8x4xf32>,
    return
  }
  func.func @transform_0(%arg0: i32) -> (i32, i32) {
    %c0_i32 = arith.constant 0 : i32
    %c0_i32_0 = arith.constant 0 : i32
    return %arg0, %c0_i32 : i32, i32
  }
  func.func @transform_1(%arg0: i32) -> (i32, i32) {
    %c0_i32 = arith.constant 0 : i32
    %c0_i32_0 = arith.constant 0 : i32
    %c0_i32_1 = arith.constant 0 : i32
    return %c0_i32, %c0_i32_0 : i32, i32
  }
  func.func @transform_2(%arg0: i32) -> (i32, i32) {
    %c0_i32 = arith.constant 0 : i32
    %c0_i32_0 = arith.constant 0 : i32
    %c0_i32_1 = arith.constant 0 : i32
    return %c0_i32, %c0_i32_0 : i32, i32
  }
  func.func @transform_3(%arg0: i32) -> (i32, i32) {
    %c0_i32 = arith.constant 0 : i32
    %c0_i32_0 = arith.constant 0 : i32
    %c0_i32_1 = arith.constant 0 : i32
    return %c0_i32, %c0_i32_0 : i32, i32
  }
  func.func @transform_4(%arg0: i32) -> (i32, i32) {
    %c0_i32 = arith.constant 0 : i32
    %c0_i32_0 = arith.constant 0 : i32
    %c0_i32_1 = arith.constant 0 : i32
    return %c0_i32, %c0_i32_0 : i32, i32
  }
  func.func @transform_5(%arg0: i32) -> (i32, i32) {
    %c0_i32 = arith.constant 0 : i32
    %c0_i32_0 = arith.constant 0 : i32
    %c0_i32_1 = arith.constant 0 : i32
    return %c0_i32, %c0_i32_0 : i32, i32
  }
  func.func @transform_6(%arg0: i32) -> (i32, i32) {
    %c0_i32 = arith.constant 0 : i32
    %c0_i32_0 = arith.constant 0 : i32
    %c0_i32_1 = arith.constant 0 : i32
    return %c0_i32, %c0_i32_0 : i32, i32
  }
  func.func @transform_7(%arg0: i32) -> (i32, i32) {
    %c0_i32 = arith.constant 0 : i32
    %c0_i32_0 = arith.constant 0 : i32
    return %arg0, %c0_i32 : i32, i32
  }
}

</mosaic_0001>

<bundles_post_ra>
// kernel: tpu_custom_call.1
= control target key start
LH: loop header
LB: loop body
LE: loop exit
PB: predicated region body
PF: predicated region fallthrough
CT: control target
= control target key end

     0   :  { %12 = vsyncpa [#allocation3], 0  ;;  %s737_s24 = smov [#allocation2]   ;;  %s871_s0 = inlined_call_operand.vmem [shape: f32[8,32], index: 0, kind: input, shape index: {}]   ;;  %s872_s1 = inlined_call_operand.vmem [shape: f32[32,256], index: 1, kind: input, shape index: {}]   ;;  %s873_s2 = inlined_call_operand.vmem [shape: f32[1,256], index: 2, kind: input, shape index: {}]   ;;  %s874_s3 = inlined_call_operand.hbm [shape: bf16[256,256], index: 3, kind: input, shape index: {}]   ;;  %s875_s4 = inlined_call_operand.vmem [shape: f32[1,256], index: 4, kind: input, shape index: {}]   ;;  %s876_s5 = inlined_call_operand.vmem [shape: bf16[256,4], index: 5, kind: input, shape index: {}]   ;;  %s877_s6 = inlined_call_operand.vmem [shape: f32[1,4], index: 6, kind: input, shape index: {}]   ;;  %s878_s7 = inlined_call_operand.vmem [shape: f32[8,4], index: 7, kind: output, shape index: {}]  }
   0x1   :  { %s24_s25 = sshll.u32 %s737_s24, 4  ;;  %s25_s25 = int_to_ptr.vmem [resolvable:$true] %s24_s25 }
   0x2   :  { %s723_s26 = scalar_lea.vmem %s25_s25, 4096  ;;  %p728_p1 = scmp.lt.s32.totalorder %s25_s25, %s25_s25 }
   0x3   :  { %p724_p0 = scmp.ne.s32.totalorder %s25_s25, %s723_s26  ;;  %p729_p2 = scmp.lt.s32.totalorder %s723_s26, %s723_s26 }
   0x5   :  { %p730_p3 = por %p729_p2, %p728_p1 }
   0x7   :  { %p731_p4 = pnand %p730_p3, %p724_p0 }
   0x9   :  { %734 = shalt.err (!%p731_p4)
}
   0xa   :  { %s738_s27 = smov 128   ;;  %s739_s28 = smov 8  }
   0xb   :  { %30 = dma.hbm_to_vmem [thread:$0]  %s874_s3, 4096, %s25_s25, [#allocation3], %s738_s27, %s738_s27, %s739_s28  }
   0xc   :  { %735 = dma.done.wait [#allocation3], 4096  }
   0xd   :  { %736 = vsyncadd [#allocation3], 4294963200  ;;  %v740_v0 = vmov 0.0   ;;  %v49_v1 = vld [vmem:[%s872_s1 + $0x38] sm:$0xff]  ;;  %v48_v2 = vld [vmem:[%s872_s1 + $0x30] sm:$0xff]  ;;  %vm62_vm0 = vcmask 261120   ;;  %v52_v54 = vlaneseq }
   0xe   :  { %130 = vmatprep.mubr.f32.mxu0 %v740_v0  ;;  %v47_v3 = vld [vmem:[%s872_s1 + $0x28] sm:$0xff]  ;;  %90 = vmatprep.subr.mxu0 %v49_v1  ;;  %v46_v4 = vld [vmem:[%s872_s1 + $0x20] sm:$0xff]  ;;  %v45_v5 = vld [vmem:[%s872_s1 + $0x18] sm:$0xff]  ;;  %vm566_vm1 = vcmask 31744  }
   0xf   :  { %91 = vmatpush1.msra.mxu0 %v48_v2  ;;  %v44_v6 = vld [vmem:[%s872_s1 + $0x10] sm:$0xff]  ;;  %v43_v7 = vld [vmem:[%s872_s1 + $0x8] sm:$0xff]  ;;  %v42_v10 = vld [vmem:[%s872_s1] sm:$0xff]  ;;  %v53_v55 = vshrl.u32 %v52_v54, 7 }
  0x10   :  { %92 = vmatprep.subr.mxu0 %v47_v3  ;;  %v649_v8 = vld [vmem:[#allocation2 + $0x74] ss:$8 sps:$4 sm:$0xff]   ;;  %v651_v9 = vld [vmem:[#allocation2 + $0x70] ss:$8 sps:$4 sm:$0xff]   ;;  %v652_v11 = vld [vmem:[#allocation2 + $0x64] ss:$8 sps:$4 sm:$0xff]  }
  0x11   :  { %93 = vmatpush1.msra.mxu0 %v46_v4  ;;  %345 = vmatprep.subr.bf16.mxu1 %v649_v8  ;;  %v41_v12 = vld [vmem:[%s871_s0] sm:$0xff]  ;;  %v655_v14 = vld [vmem:[#allocation2 + $0x54] ss:$8 sps:$4 sm:$0xff]   ;;  %v657_v15 = vld [vmem:[#allocation2 + $0x50] ss:$8 sps:$4 sm:$0xff]   ;;  %v54_v56 = vsub.s32 0, %v53_v55 }
  0x12   :  { %94 = vmatprep.subr.mxu0 %v45_v5  ;;  %346 = vmatpush1.bf16.msra.mxu1 %v651_v9  ;;  %v654_v13 = vld [vmem:[#allocation2 + $0x60] ss:$8 sps:$4 sm:$0xff]   ;;  %v658_v16 = vld [vmem:[#allocation2 + $0x44] ss:$8 sps:$4 sm:$0xff]   ;;  %v661_v18 = vld [vmem:[#allocation2 + $0x34] ss:$8 sps:$4 sm:$0xff]  }
  0x13   :  { %95 = vmatpush1.msra.mxu0 %v44_v6  ;;  %347 = vmatprep.subr.bf16.mxu1 %v652_v11  ;;  %v660_v17 = vld [vmem:[#allocation2 + $0x40] ss:$8 sps:$4 sm:$0xff]   ;;  %v663_v19 = vld [vmem:[#allocation2 + $0x30] ss:$8 sps:$4 sm:$0xff]   ;;  %v664_v20 = vld [vmem:[#allocation2 + $0x24] ss:$8 sps:$4 sm:$0xff]  }
  0x14   :  { %96 = vmatprep.subr.mxu0 %v43_v7  ;;  %v666_v21 = vld [vmem:[#allocation2 + $0x20] ss:$8 sps:$4 sm:$0xff]   ;;  %v667_v22 = vld [vmem:[#allocation2 + $0x14] ss:$8 sps:$4 sm:$0xff]   ;;  %v669_v23 = vld [vmem:[#allocation2 + $0x10] ss:$8 sps:$4 sm:$0xff]  }
  0x15   :  { %97 = vmatpush1.msra.mxu0 %v42_v10  ;;  %v670_v24 = vld [vmem:[#allocation2 + $0x4] ss:$8 sps:$4 sm:$0xff]   ;;  %v672_v25 = vld [vmem:[#allocation2] ss:$8 sps:$4 sm:$0xff]   ;;  %v673_v26 = vld [vmem:[#allocation2 + $0xf4] ss:$8 sps:$4 sm:$0xff]  }
  0x16   :  { %573 = vmatmul.mubr.msk.f32.vlgmr.msra.gmra.mxu0 %vm62_vm0, %v41_v12  ;;  %348 = vmatpush1.bf16.msra.mxu1 %v654_v13  ;;  %v675_v27 = vld [vmem:[#allocation2 + $0xf0] ss:$8 sps:$4 sm:$0xff]   ;;  %v676_v28 = vld [vmem:[#allocation2 + $0xe4] ss:$8 sps:$4 sm:$0xff]   ;;  %v678_v29 = vld [vmem:[#allocation2 + $0xe0] ss:$8 sps:$4 sm:$0xff]  }
  0x17   :  { %349 = vmatprep.subr.bf16.mxu1 %v655_v14  ;;  %v679_v30 = vld [vmem:[#allocation2 + $0xd4] ss:$8 sps:$4 sm:$0xff]   ;;  %v681_v31 = vld [vmem:[#allocation2 + $0xd0] ss:$8 sps:$4 sm:$0xff]   ;;  %v682_v32 = vld [vmem:[#allocation2 + $0xc4] ss:$8 sps:$4 sm:$0xff]  }
  0x18   :  { %v684_v33 = vld [vmem:[#allocation2 + $0xc0] ss:$8 sps:$4 sm:$0xff]   ;;  %v685_v34 = vld [vmem:[#allocation2 + $0xb4] ss:$8 sps:$4 sm:$0xff]   ;;  %v687_v35 = vld [vmem:[#allocation2 + $0xb0] ss:$8 sps:$4 sm:$0xff]  }
  0x19   :  { %v688_v36 = vld [vmem:[#allocation2 + $0xa4] ss:$8 sps:$4 sm:$0xff]   ;;  %v690_v37 = vld [vmem:[#allocation2 + $0xa0] ss:$8 sps:$4 sm:$0xff]   ;;  %v691_v38 = vld [vmem:[#allocation2 + $0x94] ss:$8 sps:$4 sm:$0xff]  }
  0x1a   :  { %350 = vmatpush1.bf16.msra.mxu1 %v657_v15  ;;  %v693_v39 = vld [vmem:[#allocation2 + $0x90] ss:$8 sps:$4 sm:$0xff]   ;;  %v694_v40 = vld [vmem:[#allocation2 + $0x84] ss:$8 sps:$4 sm:$0xff]   ;;  %v696_v41 = vld [vmem:[#allocation2 + $0x80] ss:$8 sps:$4 sm:$0xff]  }
  0x1b   :  { %351 = vmatprep.subr.bf16.mxu1 %v658_v16  ;;  %v697_v42 = vld [vmem:[%s876_s5 + $0x78] sm:$0xff]   ;;  %v699_v44 = vld [vmem:[%s876_s5 + $0x70] sm:$0xff]   ;;  %v701_v46 = vld [vmem:[%s876_s5 + $0x68] sm:$0xff]   ;;  %v58_v58 = vsub.s32 1, %v53_v55 }
  0x1c   :  { %v698_v43 = vld [vmem:[%s876_s5 + $0x38] sm:$0xff]   ;;  %623 = vmatprep.subr.bf16.mxu0 %v697_v42  ;;  %v700_v45 = vld [vmem:[%s876_s5 + $0x30] sm:$0xff]   ;;  %v702_v47 = vld [vmem:[%s876_s5 + $0x28] sm:$0xff]  }
  0x1d   :  { %624 = vmatpush3.bf16.msra.mxu0 %v698_v43  ;;  %v703_v48 = vld [vmem:[%s876_s5 + $0x60] sm:$0xff]   ;;  %v705_v50 = vld [vmem:[%s876_s5 + $0x58] sm:$0xff]   ;;  %v707_v52 = vld [vmem:[%s876_s5 + $0x50] sm:$0xff]  }
  0x1e   :  { %352 = vmatpush1.bf16.msra.mxu1 %v660_v17  ;;  %625 = vmatprep.subr.bf16.mxu0 %v699_v44  ;;  %v704_v49 = vld [vmem:[%s876_s5 + $0x20] sm:$0xff]   ;;  %v706_v51 = vld [vmem:[%s876_s5 + $0x18] sm:$0xff]   ;;  %v708_v53 = vld [vmem:[%s876_s5 + $0x10] sm:$0xff]  }
  0x1f   :  { %353 = vmatprep.subr.bf16.mxu1 %v661_v18  ;;  %v50_v57 = vld [vmem:[%s873_s2] sm:$0x3]  ;;  %v709_v5 = vld [vmem:[%s876_s5 + $0x48] sm:$0xff]  }
  0x20   :  { %v55_v59 = vrot.slane %v50_v57, %v54_v56  ;;  %v59_v60 = vrot.slane %v50_v57, %v58_v58  ;;  %v710_v6 = vld [vmem:[%s876_s5 + $0x8] sm:$0xff]   ;;  %v711_v7 = vld [vmem:[%s876_s5 + $0x40] sm:$0xff]  }
  0x21   :  { %626 = vmatpush3.bf16.msra.mxu0 %v700_v45  ;;  %v712_v8 = vld [vmem:[%s876_s5] sm:$0xff]  }
  0x22   :  { %354 = vmatpush1.bf16.msra.mxu1 %v663_v19  ;;  %627 = vmatprep.subr.bf16.mxu0 %v701_v46  ;;  %v173_v9 = vld [vmem:[%s875_s4] sm:$0x3] }
  0x23   :  { %355 = vmatprep.subr.bf16.mxu1 %v664_v20  ;;  %v178_v10 = vrot.slane %v173_v9, %v54_v56  ;;  %v182_v11 = vrot.slane %v173_v9, %v58_v58 }
  0x25   :  { %628 = vmatpush3.bf16.msra.mxu0 %v702_v47 }
  0x26   :  { %356 = vmatpush1.bf16.msra.mxu1 %v666_v21  ;;  %629 = vmatprep.subr.bf16.mxu0 %v703_v48 }
  0x27   :  { %357 = vmatprep.subr.bf16.mxu1 %v667_v22 }
  0x29   :  { %630 = vmatpush3.bf16.msra.mxu0 %v704_v49 }
  0x2a   :  { %358 = vmatpush1.bf16.msra.mxu1 %v669_v23  ;;  %631 = vmatprep.subr.bf16.mxu0 %v705_v50  ;;  %v606_v23 = vld [vmem:[%s877_s6] ss:$0 sm:$0xff] }
  0x2b   :  { %359 = vmatprep.subr.bf16.mxu1 %v670_v24 }
  0x2d   :  { %632 = vmatpush3.bf16.msra.mxu0 %v706_v51 }
  0x2e   :  { %360 = vmatpush1.bf16.msra.mxu1 %v672_v25  ;;  %633 = vmatprep.subr.bf16.mxu0 %v707_v52 }
  0x2f   :  { %361 = vmatprep.subr.bf16.mxu1 %v673_v26 }
  0x31   :  { %634 = vmatpush3.bf16.msra.mxu0 %v708_v53 }
  0x32   :  { %362 = vmatpush2.bf16.msra.mxu1 %v675_v27  ;;  %635 = vmatprep.subr.bf16.mxu0 %v709_v5 }
  0x33   :  { %363 = vmatprep.subr.bf16.mxu1 %v676_v28 }
  0x35   :  { %636 = vmatpush3.bf16.msra.mxu0 %v710_v6 }
  0x36   :  { %364 = vmatpush2.bf16.msra.mxu1 %v678_v29  ;;  %637 = vmatprep.subr.bf16.mxu0 %v711_v7 }
  0x37   :  { %365 = vmatprep.subr.bf16.mxu1 %v679_v30 }
  0x39   :  { %638 = vmatpush3.bf16.msra.mxu0 %v712_v8 }
  0x3a   :  { %366 = vmatpush2.bf16.msra.mxu1 %v681_v31 }
  0x3b   :  { %367 = vmatprep.subr.bf16.mxu1 %v682_v32 }
  0x3e   :  { %368 = vmatpush2.bf16.msra.mxu1 %v684_v33 }
  0x3f   :  { %369 = vmatprep.subr.bf16.mxu1 %v685_v34 }
  0x42   :  { %370 = vmatpush2.bf16.msra.mxu1 %v687_v35 }
  0x43   :  { %371 = vmatprep.subr.bf16.mxu1 %v688_v36 }
  0x46   :  { %372 = vmatpush2.bf16.msra.mxu1 %v690_v37 }
  0x47   :  { %373 = vmatprep.subr.bf16.mxu1 %v691_v38 }
  0x4a   :  { %374 = vmatpush2.bf16.msra.mxu1 %v693_v39 }
  0x4b   :  { %375 = vmatprep.subr.bf16.mxu1 %v694_v40 }
  0x4e   :  { %376 = vmatpush2.bf16.msra.mxu1 %v696_v41 }
  0xd6   :  { %v132_v61 = vpop.f32.mrf.mxu0 }
  0xd7   :  { %v133_v62 = vadd.f32 %v132_v61, %v55_v59 }
  0xd8   :  { %v134_v63 = vpop.f32.mrf.mxu0 }
  0xd9   :  { %v135_v0 = vadd.f32 %v134_v63, %v59_v60  ;;  %v137_v1 = vmax.f32 %v133_v62, 0.0 }
  0xdb   :  { %v138_v2 = vmax.f32 %v135_v0, 0.0  ;;  %v139_v4 = vpack.c.bf16 %v137_v1, %v137_v1 }
  0xdd   :  { %v140_v3 = vpack.c.bf16 %v138_v2, %v138_v2 }
  0xdf   :  { %377 = vmatprep.mubr.bf16.mxu1 %v140_v3 }
  0xe0   :  { %378 = vmatmul.mubr.bf16.vlgmr.msra.gmra.mxu1 %v139_v4 }
 0x1a0   :  { %v379_v12 = vpop.f32.mrf.mxu1 }
 0x1a1   :  { %v380_v13 = vadd.f32 %v379_v12, %v178_v10 }
 0x1a2   :  { %v381_v14 = vpop.f32.mrf.mxu1 }
 0x1a3   :  { %v382_v15 = vadd.f32 %v381_v14, %v182_v11  ;;  %v386_v16 = vmax.f32 %v380_v13, 0.0 }
 0x1a4   :  { %v383_v17 = vpop.f32.mrf.mxu1 }
 0x1a5   :  { %v387_v18 = vmax.f32 %v382_v15, 0.0  ;;  %v388_v21 = vpack.c.bf16 %v386_v16, %v386_v16 }
 0x1a6   :  { %v384_v19 = vpop.f32.mrf.mxu1 }
 0x1a7   :  { %v389_v20 = vpack.c.bf16 %v387_v18, %v387_v18 }
 0x1a9   :  { %557 = vmatprep.mubr.bf16.mxu0 %v389_v20 }
 0x1aa   :  { %558 = vmatmul.mubr.bf16.vlgmr.msra.gmra.mxu0 %v388_v21 }
 0x26a   :  { %v639_v22 = vpop.f32.mrf.mxu0 }
 0x26c   :  { %v640_v24 = vpop.f32.mrf.mxu0 }
 0x26d   :  { %v641_v25 = vadd.f32 %v640_v24, %v639_v22 }
 0x26e   :  { %v642_v26 = vpop.f32.mrf.mxu0 }
 0x26f   :  { %v560_v27 = vadd.f32 %v641_v25, %v606_v23 }
 0x270   :  { %v643_v28 = vpop.f32.mrf.mxu0 }
 0x271   :  { %713 = vtanh.f32 %v560_v27 }
 0x27e   :  { %v714_v29 = vpop.eup %713 }
 0x27f   :  { %567 = vst.msk [vmem:[%s878_s7] sm:$0xff] %vm566_vm1, %v714_v29 }
 0x280   :  { %572 = vsyncpa [#allocation3], 1 }

</bundles_post_ra>
